<compile_context>
chip_gen: v5e
topology: v5e:2x2
jax: 0.10.0
libtpu: 0.0.40
codegen_flags: <defaults>
</compile_context>

<pallas_src>
import functools
import math

import numpy as np
import jax
import jax.numpy as jnp
from jax.experimental import pallas as pl
from jax.experimental.pallas import tpu as pltpu

# ----------------------------- configuration --------------------------------
NUM_CLASSES = 4          # background + 3 object classes
C = 16                   # feature channels
FH = FW = 16             # feature map spatial size
IMG_H = IMG_W = 64       # image_shape = (H, W)
SPATIAL_SCALE = FW / IMG_W
POOL = 7                 # RoIAlign output size
SAMPLING = 2             # RoIAlign sampling ratio
MID = 32                 # FastRCNNPredictor hidden size
N_PROP = 8               # number of proposals

REG_WEIGHTS = (10.0, 10.0, 5.0, 5.0)
SCORE_THRESH = 0.1
NMS_THRESH = 0.5
NUM_DETECTIONS = 100
MIN_SIZE = 1
BBOX_XFORM_CLIP = math.log(1000.0 / 16.0)

# lane-dense padded sizes for the TPU kernel
D_RAW = C * POOL * POOL                      # 784
D_PAD = ((D_RAW + 127) // 128) * 128         # 896
MID_PAD = 128                                # hidden width padded to one vreg
OUT_W = 128                                  # single lane-dense output slab


# ----------------------- fused Pallas kernel (predict + decode) -------------
def _fused_kernel(x_ref, w1_ref, b1_ref, w2_ref, b2_ref, whead_ref, bhead_ref,
                  prop_ref, out_ref, *, num_classes, reg_weights, clip_val,
                  img_w, img_h):
    k = num_classes
    wx, wy, ww, whr = reg_weights

    # ---- FastRCNNPredictor MLP (MXU): fc1+ReLU, fc2+ReLU, merged heads ----
    x = x_ref[...]
    h1 = jnp.maximum(
        jnp.dot(x, w1_ref[...], preferred_element_type=jnp.float32) + b1_ref[...], 0.0)
    h2 = jnp.maximum(
        jnp.dot(h1, w2_ref[...], preferred_element_type=jnp.float32) + b2_ref[...], 0.0)
    raw = jnp.dot(h2, whead_ref[...], preferred_element_type=jnp.float32) + bhead_ref[...]
    # raw columns: [0:k] class logits, [k:5k] bbox deltas packed coordinate-major
    # (dx for all classes, then dy, dw, dh); [5k:OUT_W] exact zeros (padded head).

    # ---- softmax over class logits (F.softmax(class_logit, dim=-1)) ----
    logits = raw[:, 0:k]
    m = jnp.max(logits, axis=-1, keepdims=True)
    e = jnp.exp(logits - m)
    probs = e * pl.reciprocal(jnp.sum(e, axis=-1, keepdims=True), approx=False)

    # ---- BoxCoder.decode + clip-to-image, vectorised over all classes ----
    p = prop_ref[...]
    px1 = p[:, 0:1]
    py1 = p[:, 1:2]
    px2 = p[:, 2:3]
    py2 = p[:, 3:4]
    pw = px2 - px1
    ph = py2 - py1
    pcx = px1 + 0.5 * pw
    pcy = py1 + 0.5 * ph

    dx = raw[:, k:2 * k] * (1.0 / wx)
    dy = raw[:, 2 * k:3 * k] * (1.0 / wy)
    dw = jnp.minimum(raw[:, 3 * k:4 * k] * (1.0 / ww), clip_val)
    dh = jnp.minimum(raw[:, 4 * k:5 * k] * (1.0 / whr), clip_val)

    cx = dx * pw + pcx            # (N, K): proposal geometry broadcast over classes
    cy = dy * ph + pcy
    pred_w = jnp.exp(dw) * pw
    pred_h = jnp.exp(dh) * ph

    # process_box clipping: x clamped to image width, y to image height.
    xmin = jnp.clip(cx - 0.5 * pred_w, 0.0, img_w)
    ymin = jnp.clip(cy - 0.5 * pred_h, 0.0, img_h)
    xmax = jnp.clip(cx + 0.5 * pred_w, 0.0, img_w)
    ymax = jnp.clip(cy + 0.5 * pred_h, 0.0, img_h)

    n_rows, n_lanes = out_ref.shape
    pad = jnp.zeros((n_rows, n_lanes - 5 * k), dtype=jnp.float32)
    # single lane-dense (N, 128) slab -> one unmasked store
    out_ref[...] = jnp.concatenate([probs, xmin, ymin, xmax, ymax, pad], axis=-1)


def _fused_predict_decode(x, w1p, b1p, w2p, b2p, wheadp, bheadp, proposal,
                          image_shape):
    n = x.shape[0]
    kern = functools.partial(
        _fused_kernel,
        num_classes=NUM_CLASSES,
        reg_weights=tuple(float(v) for v in REG_WEIGHTS),
        clip_val=float(BBOX_XFORM_CLIP),
        img_w=float(image_shape[1]),
        img_h=float(image_shape[0]))
    vmem = lambda: pl.BlockSpec(memory_space=pltpu.MemorySpace.VMEM)
    return pl.pallas_call(
        kern,
        out_shape=jax.ShapeDtypeStruct((n, OUT_W), jnp.float32),
        in_specs=[vmem() for _ in range(8)],
        out_specs=vmem(),
    )(x, w1p, b1p, w2p, b2p, wheadp, bheadp, proposal)


# ----------------------- parameter packing (done once, host side) -----------
def pack_params(params):
    """Merge cls/bbox heads (coordinate-major columns) and zero-pad to lane-dense
    shapes. Zero padding is exact: padded hidden units stay 0 through ReLU and
    padded head columns stay 0 in the output slab.  Called ONCE at setup time
    so the padded weights are not rebuilt inside the jitted forward."""
    w1, b1, w2, b2, wc, bc, wb, bb = [np.asarray(a, dtype=np.float32) for a in params]
    k = NUM_CLASSES
    # reorder bbox head columns from per-class (dx,dy,dw,dh) to coordinate-major
    wb_r = wb.reshape(MID, k, 4).transpose(0, 2, 1).reshape(MID, 4 * k)
    bb_r = bb.reshape(1, k, 4).transpose(0, 2, 1).reshape(1, 4 * k)
    whead = np.concatenate([wc, wb_r], axis=1)            # (MID, 5K)
    bhead = np.concatenate([bc, bb_r], axis=1)            # (1, 5K)

    w1p = np.pad(w1, ((0, D_PAD - D_RAW), (0, MID_PAD - MID)))
    b1p = np.pad(b1, ((0, 0), (0, MID_PAD - MID)))
    w2p = np.pad(w2, ((0, MID_PAD - MID), (0, MID_PAD - MID)))
    b2p = np.pad(b2, ((0, 0), (0, MID_PAD - MID)))
    wheadp = np.pad(whead, ((0, MID_PAD - MID), (0, OUT_W - 5 * k)))
    bheadp = np.pad(bhead, ((0, 0), (0, OUT_W - 5 * k)))
    return tuple(jnp.asarray(a) for a in (w1p, b1p, w2p, b2p, wheadp, bheadp))


# ----------------------------- JAX glue: RoIAlign ---------------------------
# TODO(synk): RoIAlign's data-dependent bilinear gather has no clean Pallas TPU
# equivalent (dynamic per-lane gather); kept in plain JAX/XLA inside the jit.
def roi_align(feature, rois, spatial_scale, output_size, sampling_ratio):
    # feature: (C, H, W) single image
    c, h, w = feature.shape
    n = rois.shape[0]
    s = sampling_ratio
    p = output_size
    r = rois * spatial_scale
    x1 = r[:, 0]
    y1 = r[:, 1]
    roi_w = jnp.maximum(r[:, 2] - x1, 1.0)
    roi_h = jnp.maximum(r[:, 3] - y1, 1.0)
    bin_w = roi_w / p
    bin_h = roi_h / p

    off = (jnp.arange(s, dtype=jnp.float32) + 0.5) / s          # (S,)
    pidx = jnp.arange(p, dtype=jnp.float32)                     # (P,)
    ys = y1[:, None, None] + (pidx[None, :, None] + off[None, None, :]) * bin_h[:, None, None]
    xs = x1[:, None, None] + (pidx[None, :, None] + off[None, None, :]) * bin_w[:, None, None]

    Y = jnp.broadcast_to(ys[:, :, :, None, None], (n, p, s, p, s))
    X = jnp.broadcast_to(xs[:, None, None, :, :], (n, p, s, p, s))
    valid = (Y > -1.0) & (Y < h) & (X > -1.0) & (X < w)
    Yc = jnp.clip(Y, 0.0, h - 1)
    Xc = jnp.clip(X, 0.0, w - 1)
    y0 = jnp.floor(Yc).astype(jnp.int32)
    x0 = jnp.floor(Xc).astype(jnp.int32)
    y1i = jnp.minimum(y0 + 1, h - 1)
    x1i = jnp.minimum(x0 + 1, w - 1)
    ly = Yc - y0.astype(jnp.float32)
    lx = Xc - x0.astype(jnp.float32)
    hy = 1.0 - ly
    hx = 1.0 - lx

    v00 = feature[:, y0, x0]
    v01 = feature[:, y0, x1i]
    v10 = feature[:, y1i, x0]
    v11 = feature[:, y1i, x1i]
    val = (hy * hx * v00 + hy * lx * v01 + ly * hx * v10 + ly * lx * v11)
    val = val * valid.astype(feature.dtype)
    pooled = val.mean(axis=(3, 5))                 # (C, N, P, P)
    return jnp.transpose(pooled, (1, 0, 2, 3))     # (N, C, P, P)


# --------------- on-device post-processing (fixed-shape greedy NMS) ---------
def _nms_device(scores, boxes):
    """Exact greedy per-class NMS with fixed shapes, vectorised over foreground
    classes; runs on device inside the jit (no mid-pipeline host sync).

    scores: (N, K) softmax probs; boxes: (N, K, 4) decoded + clipped boxes.
    Returns keep mask / scores / boxes of shape (K-1, N[, 4]).
    """
    fg_scores = jnp.transpose(scores[:, 1:], (1, 0))            # (K-1, N)
    fg_boxes = jnp.transpose(boxes[:, 1:, :], (1, 0, 2))        # (K-1, N, 4)
    x1 = fg_boxes[..., 0]
    y1 = fg_boxes[..., 1]
    x2 = fg_boxes[..., 2]
    y2 = fg_boxes[..., 3]
    bw = x2 - x1
    bh = y2 - y1
    # score threshold + process_box min-size filter
    valid = (fg_scores >= SCORE_THRESH) & (bw >= MIN_SIZE) & (bh >= MIN_SIZE)

    area = bw * bh
    xx1 = jnp.maximum(x1[:, :, None], x1[:, None, :])
    yy1 = jnp.maximum(y1[:, :, None], y1[:, None, :])
    xx2 = jnp.minimum(x2[:, :, None], x2[:, None, :])
    yy2 = jnp.minimum(y2[:, :, None], y2[:, None, :])
    inter = jnp.maximum(xx2 - xx1, 0.0) * jnp.maximum(yy2 - yy1, 0.0)
    iou = inter / (area[:, :, None] + area[:, None, :] - inter + 1e-12)

    n = fg_scores.shape[1]
    idx = jnp.arange(n)
    remaining = valid
    keep = jnp.zeros_like(valid)
    for _ in range(n):                                          # static trip count (N=8)
        masked = jnp.where(remaining, fg_scores, -jnp.inf)
        i = jnp.argmax(masked, axis=1)                          # (K-1,)
        has = jnp.any(remaining, axis=1)                        # (K-1,)
        pick = (idx[None, :] == i[:, None]) & has[:, None]
        keep = keep | pick
        iou_i = jnp.take_along_axis(iou, i[:, None, None], axis=1)[:, 0, :]
        suppress = (iou_i > NMS_THRESH) | (idx[None, :] == i[:, None])
        remaining = remaining & ~suppress
    return keep, fg_scores, fg_boxes


# ------------------------------ jitted device path --------------------------
@functools.partial(jax.jit, static_argnames=("image_shape",))
def roi_heads_device(feature, proposal, packed_params, image_shape):
    w1p, b1p, w2p, b2p, wheadp, bheadp = packed_params
    box_feature = roi_align(feature[0], proposal, SPATIAL_SCALE, POOL, SAMPLING)
    x = box_feature.reshape(box_feature.shape[0], -1)           # (N, C*7*7) c-major
    x = jnp.pad(x, ((0, 0), (0, D_PAD - x.shape[1])))           # lane-align to 896

    out = _fused_predict_decode(x, w1p, b1p, w2p, b2p, wheadp, bheadp,
                                proposal, image_shape)          # (N, 128) slab
    k = NUM_CLASSES
    scores = out[:, 0:k]                                        # (N, K)
    boxes = jnp.stack([out[:, k:2 * k], out[:, 2 * k:3 * k],
                       out[:, 3 * k:4 * k], out[:, 4 * k:5 * k]], axis=-1)  # (N,K,4)
    keep, fg_scores, fg_boxes = _nms_device(scores, boxes)
    return scores, boxes, keep, fg_scores, fg_boxes


# -------------------------------- forward -----------------------------------
def roi_heads_forward(feature, proposal, image_shape, packed_params):
    """Inference-path forward of RoIHeads (mask head disabled)."""
    outs = roi_heads_device(feature, proposal, packed_params,
                            tuple(int(s) for s in image_shape))
    outs = jax.block_until_ready(outs)
    scores, boxes, keep, fg_scores, fg_boxes = outs

    # single device->host transfer of small fixed-size tensors, then
    # variable-length compaction (dynamic output shapes -> host numpy).
    keep_np = np.asarray(keep)
    s_np = np.asarray(fg_scores)
    b_np = np.asarray(fg_boxes)
    all_boxes, all_labels, all_scores = [], [], []
    for ci in range(keep_np.shape[0]):           # foreground classes 1..K-1
        sel = np.nonzero(keep_np[ci])[0]
        sel = sel[np.argsort(-s_np[ci, sel], kind="stable")][:NUM_DETECTIONS]
        all_boxes.append(b_np[ci, sel])
        all_scores.append(s_np[ci, sel])
        all_labels.append(np.full((sel.shape[0],), ci + 1, dtype=np.int64))
    result = dict(
        obj_boxes=np.concatenate(all_boxes, axis=0) if all_boxes else np.zeros((0, 4), np.float32),
        obj_ids=np.concatenate(all_labels, axis=0) if all_labels else np.zeros((0,), np.int64),
        scores=np.concatenate(all_scores, axis=0) if all_scores else np.zeros((0,), np.float32),
    )
    losses = {}
    # TODO(synk): training path (Matcher, BalancedPositiveNegativeSampler,
    # fastrcnn_loss) and the affordance mask head (mask_roi_pool is None =>
    # has_mask() is False) are not exercised by this inference forward pass.
    return result, losses, (scores, boxes)


# --------------------------------- main --------------------------------------
if __name__ == "__main__":
    key = jax.random.PRNGKey(0)
    ks = jax.random.split(key, 12)

    # layout: NCHW feature (batch=1)
    feature = jax.random.normal(ks[0], (1, C, FH, FW), dtype=jnp.float32)

    # proposals in (x1, y1, x2, y2), image coords
    px = jax.random.uniform(ks[1], (N_PROP,), minval=0.0, maxval=IMG_W * 0.6)
    py = jax.random.uniform(ks[2], (N_PROP,), minval=0.0, maxval=IMG_H * 0.6)
    pw = jax.random.uniform(ks[3], (N_PROP,), minval=8.0, maxval=24.0)
    ph = jax.random.uniform(ks[4], (N_PROP,), minval=8.0, maxval=24.0)
    proposal = jnp.stack(
        [px, py, jnp.minimum(px + pw, float(IMG_W)), jnp.minimum(py + ph, float(IMG_H))],
        axis=1).astype(jnp.float32)

    # deterministic FastRCNNPredictor params (original PyTorch layout)
    D = C * POOL * POOL
    w1 = 0.01 * jax.random.normal(ks[5], (D, MID), dtype=jnp.float32)
    b1 = jnp.zeros((1, MID), jnp.float32)
    w2 = 0.01 * jax.random.normal(ks[6], (MID, MID), dtype=jnp.float32)
    b2 = jnp.zeros((1, MID), jnp.float32)
    wc = 0.01 * jax.random.normal(ks[7], (MID, NUM_CLASSES), dtype=jnp.float32)
    bc = jnp.zeros((1, NUM_CLASSES), jnp.float32)
    wb = 0.01 * jax.random.normal(ks[8], (MID, NUM_CLASSES * 4), dtype=jnp.float32)
    bb = jnp.zeros((1, NUM_CLASSES * 4), jnp.float32)
    params = (w1, b1, w2, b2, wc, bc, wb, bb)

    # one-time host-side head merge + lane padding
    packed = pack_params(params)

    result, losses, dev_outs = roi_heads_forward(
        feature, proposal, (IMG_H, IMG_W), packed)
    jax.block_until_ready(dev_outs)

    assert result["obj_boxes"].shape[1] == 4
    assert result["obj_boxes"].shape[0] == result["obj_ids"].shape[0] == result["scores"].shape[0]
    print("KERNEL_OK")
</pallas_src>

<mosaic_0001>
module attributes {stable_mosaic.version = 11 : i64} {
  func.func @_fused_kernel(%arg0: memref<8x896xf32, #tpu.memory_space<vmem>>, %arg1: memref<896x128xf32, #tpu.memory_space<vmem>>, %arg2: memref<1x128xf32, #tpu.memory_space<vmem>>, %arg3: memref<128x128xf32, #tpu.memory_space<vmem>>, %arg4: memref<1x128xf32, #tpu.memory_space<vmem>>, %arg5: memref<128x128xf32, #tpu.memory_space<vmem>>, %arg6: memref<1x128xf32, #tpu.memory_space<vmem>>, %arg7: memref<8x4xf32, #tpu.memory_space<vmem>>, %arg8: memref<8x128xf32, #tpu.memory_space<vmem>>) attributes {dimension_semantics = [], scalar_prefetch = 0 : i64, scratch_operands = 0 : i64, tpu.core_type = #tpu.core_type<tc>} {
    %c0 = arith.constant 0 : index
    %c0_0 = arith.constant 0 : index
    %0 = vector.load %arg0[%c0, %c0_0] : memref<8x896xf32, #tpu.memory_space<vmem>>, vector<8x896xf32>
    %c0_1 = arith.constant 0 : index
    %c0_2 = arith.constant 0 : index
    %1 = vector.load %arg1[%c0_1, %c0_2] : memref<896x128xf32, #tpu.memory_space<vmem>>, vector<896x128xf32>
    %cst = arith.constant dense<0.000000e+00> : vector<8x128xf32>
    %2 = tpu.matmul %0, %1, %cst {dimension_numbers = #tpu.dot_dimension_numbers<[1], [0], [0], [1], [0, 0, 1, 1], [], []>} : vector<8x896xf32>, vector<896x128xf32>, vector<8x128xf32> -> vector<8x128xf32>
    %c0_3 = arith.constant 0 : index
    %c0_4 = arith.constant 0 : index
    %3 = vector.load %arg2[%c0_3, %c0_4] : memref<1x128xf32, #tpu.memory_space<vmem>>, vector<1x128xf32>
    %4 = vector.broadcast %3 : vector<1x128xf32> to vector<8x128xf32>
    %5 = arith.addf %2, %4 : vector<8x128xf32>
    %cst_5 = arith.constant 0.000000e+00 : f32
    %6 = vector.broadcast %cst_5 : f32 to vector<8x128xf32>
    %7 = arith.maximumf %5, %6 : vector<8x128xf32>
    %c0_6 = arith.constant 0 : index
    %c0_7 = arith.constant 0 : index
    %8 = vector.load %arg3[%c0_6, %c0_7] : memref<128x128xf32, #tpu.memory_space<vmem>>, vector<128x128xf32>
    %cst_8 = arith.constant dense<0.000000e+00> : vector<8x128xf32>
    %9 = tpu.matmul %7, %8, %cst_8 {dimension_numbers = #tpu.dot_dimension_numbers<[1], [0], [0], [1], [0, 0, 1, 1], [], []>} : vector<8x128xf32>, vector<128x128xf32>, vector<8x128xf32> -> vector<8x128xf32>
    %c0_9 = arith.constant 0 : index
    %c0_10 = arith.constant 0 : index
    %10 = vector.load %arg4[%c0_9, %c0_10] : memref<1x128xf32, #tpu.memory_space<vmem>>, vector<1x128xf32>
    %11 = vector.broadcast %10 : vector<1x128xf32> to vector<8x128xf32>
    %12 = arith.addf %9, %11 : vector<8x128xf32>
    %cst_11 = arith.constant 0.000000e+00 : f32
    %13 = vector.broadcast %cst_11 : f32 to vector<8x128xf32>
    %14 = arith.maximumf %12, %13 : vector<8x128xf32>
    %c0_12 = arith.constant 0 : index
    %c0_13 = arith.constant 0 : index
    %15 = vector.load %arg5[%c0_12, %c0_13] : memref<128x128xf32, #tpu.memory_space<vmem>>, vector<128x128xf32>
    %cst_14 = arith.constant dense<0.000000e+00> : vector<8x128xf32>
    %16 = tpu.matmul %14, %15, %cst_14 {dimension_numbers = #tpu.dot_dimension_numbers<[1], [0], [0], [1], [0, 0, 1, 1], [], []>} : vector<8x128xf32>, vector<128x128xf32>, vector<8x128xf32> -> vector<8x128xf32>
    %c0_15 = arith.constant 0 : index
    %c0_16 = arith.constant 0 : index
    %17 = vector.load %arg6[%c0_15, %c0_16] : memref<1x128xf32, #tpu.memory_space<vmem>>, vector<1x128xf32>
    %18 = vector.broadcast %17 : vector<1x128xf32> to vector<8x128xf32>
    %19 = arith.addf %16, %18 : vector<8x128xf32>
    %20 = vector.extract_strided_slice %19 {offsets = [0, 0], sizes = [8, 4], strides = [1, 1]} : vector<8x128xf32> to vector<8x4xf32>
    %cst_17 = arith.constant dense<0xFF800000> : vector<8xf32>
    %21 = vector.multi_reduction <maximumf>, %20, %cst_17 [1] : vector<8x4xf32> to vector<8xf32>
    %22 = vector.shape_cast %21 : vector<8xf32> to vector<8x1xf32>
    %23 = vector.broadcast %22 : vector<8x1xf32> to vector<8x4xf32>
    %24 = arith.subf %20, %23 : vector<8x4xf32>
    %25 = math.exp %24 : vector<8x4xf32>
    %cst_18 = arith.constant dense<0.000000e+00> : vector<8xf32>
    %26 = vector.multi_reduction <add>, %25, %cst_18 [1] : vector<8x4xf32> to vector<8xf32>
    %27 = vector.shape_cast %26 : vector<8xf32> to vector<8x1xf32>
    %28 = tpu.reciprocal %27 : vector<8x1xf32> -> vector<8x1xf32>
    %29 = vector.broadcast %28 : vector<8x1xf32> to vector<8x4xf32>
    %30 = arith.mulf %25, %29 : vector<8x4xf32>
    %c0_19 = arith.constant 0 : index
    %c0_20 = arith.constant 0 : index
    %31 = vector.load %arg7[%c0_19, %c0_20] : memref<8x4xf32, #tpu.memory_space<vmem>>, vector<8x4xf32>
    %32 = vector.extract_strided_slice %31 {offsets = [0, 0], sizes = [8, 1], strides = [1, 1]} : vector<8x4xf32> to vector<8x1xf32>
    %33 = vector.extract_strided_slice %31 {offsets = [0, 1], sizes = [8, 1], strides = [1, 1]} : vector<8x4xf32> to vector<8x1xf32>
    %34 = vector.extract_strided_slice %31 {offsets = [0, 2], sizes = [8, 1], strides = [1, 1]} : vector<8x4xf32> to vector<8x1xf32>
    %35 = vector.extract_strided_slice %31 {offsets = [0, 3], sizes = [8, 1], strides = [1, 1]} : vector<8x4xf32> to vector<8x1xf32>
    %36 = arith.subf %34, %32 : vector<8x1xf32>
    %37 = arith.subf %35, %33 : vector<8x1xf32>
    %cst_21 = arith.constant 5.000000e-01 : f32
    %38 = vector.broadcast %cst_21 : f32 to vector<8x1xf32>
    %39 = arith.mulf %38, %36 : vector<8x1xf32>
    %40 = arith.addf %32, %39 : vector<8x1xf32>
    %cst_22 = arith.constant 5.000000e-01 : f32
    %41 = vector.broadcast %cst_22 : f32 to vector<8x1xf32>
    %42 = arith.mulf %41, %37 : vector<8x1xf32>
    %43 = arith.addf %33, %42 : vector<8x1xf32>
    %44 = vector.extract_strided_slice %19 {offsets = [0, 4], sizes = [8, 4], strides = [1, 1]} : vector<8x128xf32> to vector<8x4xf32>
    %cst_23 = arith.constant 1.000000e-01 : f32
    %45 = vector.broadcast %cst_23 : f32 to vector<8x4xf32>
    %46 = arith.mulf %44, %45 : vector<8x4xf32>
    %47 = vector.extract_strided_slice %19 {offsets = [0, 8], sizes = [8, 4], strides = [1, 1]} : vector<8x128xf32> to vector<8x4xf32>
    %cst_24 = arith.constant 1.000000e-01 : f32
    %48 = vector.broadcast %cst_24 : f32 to vector<8x4xf32>
    %49 = arith.mulf %47, %48 : vector<8x4xf32>
    %50 = vector.extract_strided_slice %19 {offsets = [0, 12], sizes = [8, 4], strides = [1, 1]} : vector<8x128xf32> to vector<8x4xf32>
    %cst_25 = arith.constant 2.000000e-01 : f32
    %51 = vector.broadcast %cst_25 : f32 to vector<8x4xf32>
    %52 = arith.mulf %50, %51 : vector<8x4xf32>
    %cst_26 = arith.constant 4.13516665 : f32
    %53 = vector.broadcast %cst_26 : f32 to vector<8x4xf32>
    %54 = arith.minimumf %52, %53 : vector<8x4xf32>
    %55 = vector.extract_strided_slice %19 {offsets = [0, 16], sizes = [8, 4], strides = [1, 1]} : vector<8x128xf32> to vector<8x4xf32>
    %cst_27 = arith.constant 2.000000e-01 : f32
    %56 = vector.broadcast %cst_27 : f32 to vector<8x4xf32>
    %57 = arith.mulf %55, %56 : vector<8x4xf32>
    %cst_28 = arith.constant 4.13516665 : f32
    %58 = vector.broadcast %cst_28 : f32 to vector<8x4xf32>
    %59 = arith.minimumf %57, %58 : vector<8x4xf32>
    %60 = vector.broadcast %36 : vector<8x1xf32> to vector<8x4xf32>
    %61 = arith.mulf %46, %60 : vector<8x4xf32>
    %62 = vector.broadcast %40 : vector<8x1xf32> to vector<8x4xf32>
    %63 = arith.addf %61, %62 : vector<8x4xf32>
    %64 = vector.broadcast %37 : vector<8x1xf32> to vector<8x4xf32>
    %65 = arith.mulf %49, %64 : vector<8x4xf32>
    %66 = vector.broadcast %43 : vector<8x1xf32> to vector<8x4xf32>
    %67 = arith.addf %65, %66 : vector<8x4xf32>
    %68 = math.exp %54 : vector<8x4xf32>
    %69 = vector.broadcast %36 : vector<8x1xf32> to vector<8x4xf32>
    %70 = arith.mulf %68, %69 : vector<8x4xf32>
    %71 = math.exp %59 : vector<8x4xf32>
    %72 = vector.broadcast %37 : vector<8x1xf32> to vector<8x4xf32>
    %73 = arith.mulf %71, %72 : vector<8x4xf32>
    %cst_29 = arith.constant 5.000000e-01 : f32
    %74 = vector.broadcast %cst_29 : f32 to vector<8x4xf32>
    %75 = arith.mulf %74, %70 : vector<8x4xf32>
    %76 = arith.subf %63, %75 : vector<8x4xf32>
    %cst_30 = arith.constant 0.000000e+00 : f32
    %cst_31 = arith.constant 6.400000e+01 : f32
    %77 = vector.broadcast %cst_30 : f32 to vector<8x4xf32>
    %78 = arith.maximumf %77, %76 : vector<8x4xf32>
    %79 = vector.broadcast %cst_31 : f32 to vector<8x4xf32>
    %80 = arith.minimumf %79, %78 : vector<8x4xf32>
    %cst_32 = arith.constant 5.000000e-01 : f32
    %81 = vector.broadcast %cst_32 : f32 to vector<8x4xf32>
    %82 = arith.mulf %81, %73 : vector<8x4xf32>
    %83 = arith.subf %67, %82 : vector<8x4xf32>
    %cst_33 = arith.constant 0.000000e+00 : f32
    %cst_34 = arith.constant 6.400000e+01 : f32
    %84 = vector.broadcast %cst_33 : f32 to vector<8x4xf32>
    %85 = arith.maximumf %84, %83 : vector<8x4xf32>
    %86 = vector.broadcast %cst_34 : f32 to vector<8x4xf32>
    %87 = arith.minimumf %86, %85 : vector<8x4xf32>
    %cst_35 = arith.constant 5.000000e-01 : f32
    %88 = vector.broadcast %cst_35 : f32 to vector<8x4xf32>
    %89 = arith.mulf %88, %70 : vector<8x4xf32>
    %90 = arith.addf %63, %89 : vector<8x4xf32>
    %cst_36 = arith.constant 0.000000e+00 : f32
    %cst_37 = arith.constant 6.400000e+01 : f32
    %91 = vector.broadcast %cst_36 : f32 to vector<8x4xf32>
    %92 = arith.maximumf %91, %90 : vector<8x4xf32>
    %93 = vector.broadcast %cst_37 : f32 to vector<8x4xf32>
    %94 = arith.minimumf %93, %92 : vector<8x4xf32>
    %cst_38 = arith.constant 5.000000e-01 : f32
    %95 = vector.broadcast %cst_38 : f32 to vector<8x4xf32>
    %96 = arith.mulf %95, %73 : vector<8x4xf32>
    %97 = arith.addf %67, %96 : vector<8x4xf32>
    %cst_39 = arith.constant 0.000000e+00 : f32
    %cst_40 = arith.constant 6.400000e+01 : f32
    %98 = vector.broadcast %cst_39 : f32 to vector<8x4xf32>
    %99 = arith.maximumf %98, %97 : vector<8x4xf32>
    %100 = vector.broadcast %cst_40 : f32 to vector<8x4xf32>
    %101 = arith.minimumf %100, %99 : vector<8x4xf32>
    %cst_41 = arith.constant 0.000000e+00 : f32
    %102 = vector.broadcast %cst_41 : f32 to vector<8x108xf32>
    %103 = tpu.concatenate %30, %80, %87, %94, %101, %102 in 1 : vector<8x4xf32>, vector<8x4xf32>, vector<8x4xf32>, vector<8x4xf32>, vector<8x4xf32>, vector<8x108xf32> -> vector<8x128xf32>
    %c0_42 = arith.constant 0 : index
    %c0_43 = arith.constant 0 : index
    %104 = vector.load %arg8[%c0_42, %c0_43] : memref<8x128xf32, #tpu.memory_space<vmem>>, vector<8x128xf32>
    tpu.vector_store %arg8[%c0_42, %c0_43], %103 {strides = array<i32>} : memref<8x128xf32, #tpu.memory_space<vmem>>, vector<8x128xf32>,
    return
  }
}

</mosaic_0001>

<bundles_post_ra>
// kernel: roi_heads_device.1
= control target key start
LH: loop header
LB: loop body
LE: loop exit
PB: predicated region body
PF: predicated region fallthrough
CT: control target
= control target key end

     0   :  { %s505_s18 = smov 2   ;;  %vm374_vm0 = vcmask 31744   ;;  %vm471_vm5 = vcmask 64512   ;;  %vm473_vm6 = vcmask 97280   ;;  %vm475_vm7 = vcmask 130048   ;;  %s1034_s1 = inlined_call_operand.vmem [shape: f32[896,128], index: 1, kind: input, shape index: {}]   ;;  %s1035_s0 = inlined_call_operand.vmem [shape: f32[8,896], index: 0, kind: input, shape index: {}]   ;;  %s1036_s2 = inlined_call_operand.vmem [shape: f32[1,128], index: 2, kind: input, shape index: {}]   ;;  %s1037_s7 = inlined_call_operand.vmem [shape: f32[8,4], index: 7, kind: input, shape index: {}]   ;;  %s1038_s3 = inlined_call_operand.vmem [shape: f32[128,128], index: 3, kind: input, shape index: {}]   ;;  %s1039_s4 = inlined_call_operand.vmem [shape: f32[1,128], index: 4, kind: input, shape index: {}]   ;;  %s1040_s5 = inlined_call_operand.vmem [shape: f32[128,128], index: 5, kind: input, shape index: {}]   ;;  %s1041_s6 = inlined_call_operand.vmem [shape: f32[1,128], index: 6, kind: input, shape index: {}]   ;;  %s1042_s8 = inlined_call_operand.vmem [shape: f32[8,128], index: 8, kind: output, shape index: {}]  }
   0x1   :  { %v83_v0 = vld [vmem:[%s1034_s1 + $0x178] sm:$0xff]  ;;  %v82_v2 = vld [vmem:[%s1034_s1 + $0x170] sm:$0xff]  ;;  %v81_v5 = vld [vmem:[%s1034_s1 + $0x168] sm:$0xff]  ;;  %vm477_vm8 = vcmask 162816  }
   0x2   :  { %v51_v1 = vld [vmem:[%s1034_s1 + $0x78] sm:$0xff]  ;;  %192 = vmatpush.msra.mxu2 %v83_v0  ;;  %v50_v3 = vld [vmem:[%s1034_s1 + $0x70] sm:$0xff]  ;;  %v49_v6 = vld [vmem:[%s1034_s1 + $0x68] sm:$0xff] }
   0x3   :  { %152 = vmatpush.msra.mxu0 %v51_v1  ;;  %v67_v4 = vld [vmem:[%s1034_s1 + $0xf8] sm:$0xff]  ;;  %v66_v7 = vld [vmem:[%s1034_s1 + $0xf0] sm:$0xff]  ;;  %v65_v8 = vld [vmem:[%s1034_s1 + $0xe8] sm:$0xff] }
   0x4   :  { %172 = vmatpush.msra.mxu1 %v67_v4  ;;  %193 = vmatpush.msra.mxu2 %v82_v2  ;;  %v80_v9 = vld [vmem:[%s1034_s1 + $0x160] sm:$0xff]  ;;  %v79_v12 = vld [vmem:[%s1034_s1 + $0x158] sm:$0xff]  ;;  %v78_v15 = vld [vmem:[%s1034_s1 + $0x150] sm:$0xff] }
   0x5   :  { %153 = vmatpush.msra.mxu0 %v50_v3  ;;  %v48_v10 = vld [vmem:[%s1034_s1 + $0x60] sm:$0xff]  ;;  %v47_v13 = vld [vmem:[%s1034_s1 + $0x58] sm:$0xff]  ;;  %v46_v16 = vld [vmem:[%s1034_s1 + $0x50] sm:$0xff] }
   0x6   :  { %173 = vmatpush.msra.mxu1 %v66_v7  ;;  %194 = vmatpush.msra.mxu2 %v81_v5  ;;  %v64_v11 = vld [vmem:[%s1034_s1 + $0xe0] sm:$0xff]  ;;  %v63_v14 = vld [vmem:[%s1034_s1 + $0xd8] sm:$0xff]  ;;  %v62_v17 = vld [vmem:[%s1034_s1 + $0xd0] sm:$0xff] }
   0x7   :  { %154 = vmatpush.msra.mxu0 %v49_v6  ;;  %v77_v18 = vld [vmem:[%s1034_s1 + $0x148] sm:$0xff]  ;;  %v76_v21 = vld [vmem:[%s1034_s1 + $0x140] sm:$0xff]  ;;  %v99_v23 = vld [vmem:[%s1034_s1 + $0x1f8] sm:$0xff] }
   0x8   :  { %174 = vmatpush.msra.mxu1 %v65_v8  ;;  %195 = vmatpush.msra.mxu2 %v80_v9  ;;  %v45_v19 = vld [vmem:[%s1034_s1 + $0x48] sm:$0xff]  ;;  %v44_v22 = vld [vmem:[%s1034_s1 + $0x40] sm:$0xff]  ;;  %v98_v25 = vld [vmem:[%s1034_s1 + $0x1f0] sm:$0xff] }
   0x9   :  { %155 = vmatpush.msra.mxu0 %v48_v10  ;;  %v61_v20 = vld [vmem:[%s1034_s1 + $0xc8] sm:$0xff]  ;;  %v60_v24 = vld [vmem:[%s1034_s1 + $0xc0] sm:$0xff]  ;;  %v75_v26 = vld [vmem:[%s1034_s1 + $0x138] sm:$0xff]  ;;  %212 = vmatpush.msra.mxu3 %v99_v23 }
   0xa   :  { %175 = vmatpush.msra.mxu1 %v64_v11  ;;  %196 = vmatpush.msra.mxu2 %v79_v12  ;;  %v43_v27 = vld [vmem:[%s1034_s1 + $0x38] sm:$0xff]  ;;  %v97_v29 = vld [vmem:[%s1034_s1 + $0x1e8] sm:$0xff]  ;;  %v74_v30 = vld [vmem:[%s1034_s1 + $0x130] sm:$0xff] }
   0xb   :  { %156 = vmatpush.msra.mxu0 %v47_v13  ;;  %v59_v28 = vld [vmem:[%s1034_s1 + $0xb8] sm:$0xff]  ;;  %v42_v31 = vld [vmem:[%s1034_s1 + $0x30] sm:$0xff]  ;;  %213 = vmatpush.msra.mxu3 %v98_v25  ;;  %v96_v33 = vld [vmem:[%s1034_s1 + $0x1e0] sm:$0xff] }
   0xc   :  { %176 = vmatpush.msra.mxu1 %v63_v14  ;;  %197 = vmatpush.msra.mxu2 %v78_v15  ;;  %v58_v32 = vld [vmem:[%s1034_s1 + $0xb0] sm:$0xff]  ;;  %v73_v34 = vld [vmem:[%s1034_s1 + $0x128] sm:$0xff]  ;;  %v95_v37 = vld [vmem:[%s1034_s1 + $0x1d8] sm:$0xff] }
   0xd   :  { %157 = vmatpush.msra.mxu0 %v46_v16  ;;  %v41_v35 = vld [vmem:[%s1034_s1 + $0x28] sm:$0xff]  ;;  %214 = vmatpush.msra.mxu3 %v97_v29  ;;  %v72_v38 = vld [vmem:[%s1034_s1 + $0x120] sm:$0xff]  ;;  %v94_v41 = vld [vmem:[%s1034_s1 + $0x1d0] sm:$0xff] }
   0xe   :  { %177 = vmatpush.msra.mxu1 %v62_v17  ;;  %198 = vmatpush.msra.mxu2 %v77_v18  ;;  %v57_v36 = vld [vmem:[%s1034_s1 + $0xa8] sm:$0xff]  ;;  %v40_v39 = vld [vmem:[%s1034_s1 + $0x20] sm:$0xff]  ;;  %v71_v42 = vld [vmem:[%s1034_s1 + $0x118] sm:$0xff] }
   0xf   :  { %158 = vmatpush.msra.mxu0 %v45_v19  ;;  %215 = vmatpush.msra.mxu3 %v96_v33  ;;  %v56_v40 = vld [vmem:[%s1034_s1 + $0xa0] sm:$0xff]  ;;  %v39_v43 = vld [vmem:[%s1034_s1 + $0x18] sm:$0xff]  ;;  %v93_v45 = vld [vmem:[%s1034_s1 + $0x1c8] sm:$0xff] }
  0x10   :  { %178 = vmatpush.msra.mxu1 %v61_v20  ;;  %199 = vmatpush.msra.mxu2 %v76_v21  ;;  %v55_v44 = vld [vmem:[%s1034_s1 + $0x98] sm:$0xff]  ;;  %v70_v46 = vld [vmem:[%s1034_s1 + $0x110] sm:$0xff]  ;;  %v92_v49 = vld [vmem:[%s1034_s1 + $0x1c0] sm:$0xff] }
  0x11   :  { %159 = vmatpush.msra.mxu0 %v44_v22  ;;  %216 = vmatpush.msra.mxu3 %v95_v37  ;;  %v38_v47 = vld [vmem:[%s1034_s1 + $0x10] sm:$0xff]  ;;  %v69_v50 = vld [vmem:[%s1034_s1 + $0x108] sm:$0xff]  ;;  %v91_v53 = vld [vmem:[%s1034_s1 + $0x1b8] sm:$0xff] }
  0x12   :  { %179 = vmatpush.msra.mxu1 %v60_v24  ;;  %200 = vmatpush.msra.mxu2 %v75_v26  ;;  %v54_v48 = vld [vmem:[%s1034_s1 + $0x90] sm:$0xff]  ;;  %v37_v51 = vld [vmem:[%s1034_s1 + $0x8] sm:$0xff]  ;;  %v68_v54 = vld [vmem:[%s1034_s1 + $0x100] sm:$0xff] }
  0x13   :  { %160 = vmatpush.msra.mxu0 %v43_v27  ;;  %217 = vmatpush.msra.mxu3 %v94_v41  ;;  %v53_v52 = vld [vmem:[%s1034_s1 + $0x88] sm:$0xff]  ;;  %v36_v55 = vld [vmem:[%s1034_s1] sm:$0xff]  ;;  %v147_v56 = vld [vmem:[%s1034_s1 + $0x378] sm:$0xff] }
  0x14   :  { %180 = vmatpush.msra.mxu1 %v59_v28  ;;  %201 = vmatpush.msra.mxu2 %v74_v30  ;;  %v115_v57 = vld [vmem:[%s1034_s1 + $0x278] sm:$0xff]  ;;  %v52_v58 = vld [vmem:[%s1034_s1 + $0x80] sm:$0xff]  ;;  %v90_v59 = vld [vmem:[%s1034_s1 + $0x1b0] sm:$0xff] }
  0x15   :  { %161 = vmatpush.msra.mxu0 %v42_v31  ;;  %218 = vmatpush.msra.mxu3 %v93_v45  ;;  %v146_v60 = vld [vmem:[%s1034_s1 + $0x370] sm:$0xff]  ;;  %v131_v62 = vld [vmem:[%s1034_s1 + $0x2f8] sm:$0xff]  ;;  %v89_v63 = vld [vmem:[%s1034_s1 + $0x1a8] sm:$0xff] }
  0x16   :  { %181 = vmatpush.msra.mxu1 %v58_v32  ;;  %202 = vmatpush.msra.mxu2 %v73_v34  ;;  %v114_v61 = vld [vmem:[%s1034_s1 + $0x270] sm:$0xff]  ;;  %v145_v0 = vld [vmem:[%s1034_s1 + $0x368] sm:$0xff]  ;;  %v88_v3 = vld [vmem:[%s1034_s1 + $0x1a0] sm:$0xff] }
  0x17   :  { %162 = vmatpush.msra.mxu0 %v41_v35  ;;  %219 = vmatpush.msra.mxu3 %v92_v49  ;;  %v113_v1 = vld [vmem:[%s1034_s1 + $0x268] sm:$0xff]  ;;  %v130_v2 = vld [vmem:[%s1034_s1 + $0x2f0] sm:$0xff]  ;;  %v144_v4 = vld [vmem:[%s1034_s1 + $0x360] sm:$0xff] }
  0x18   :  { %182 = vmatpush.msra.mxu1 %v57_v36  ;;  %203 = vmatpush.msra.mxu2 %v72_v38  ;;  %v112_v5 = vld [vmem:[%s1034_s1 + $0x260] sm:$0xff]  ;;  %v129_v6 = vld [vmem:[%s1034_s1 + $0x2e8] sm:$0xff]  ;;  %v87_v7 = vld [vmem:[%s1034_s1 + $0x198] sm:$0xff] }
  0x19   :  { %163 = vmatpush.msra.mxu0 %v40_v39  ;;  %220 = vmatpush.msra.mxu3 %v91_v53  ;;  %v143_v8 = vld [vmem:[%s1034_s1 + $0x358] sm:$0xff]  ;;  %v128_v10 = vld [vmem:[%s1034_s1 + $0x2e0] sm:$0xff]  ;;  %v86_v11 = vld [vmem:[%s1034_s1 + $0x190] sm:$0xff] }
  0x1a   :  { %183 = vmatpush.msra.mxu1 %v56_v40  ;;  %204 = vmatpush.msra.mxu2 %v71_v42  ;;  %v111_v9 = vld [vmem:[%s1034_s1 + $0x258] sm:$0xff]  ;;  %v142_v12 = vld [vmem:[%s1034_s1 + $0x350] sm:$0xff]  ;;  %v85_v15 = vld [vmem:[%s1034_s1 + $0x188] sm:$0xff] }
  0x1b   :  { %164 = vmatpush.msra.mxu0 %v39_v43  ;;  %221 = vmatpush.msra.mxu3 %v90_v59  ;;  %v110_v13 = vld [vmem:[%s1034_s1 + $0x250] sm:$0xff]  ;;  %v127_v14 = vld [vmem:[%s1034_s1 + $0x2d8] sm:$0xff]  ;;  %v141_v16 = vld [vmem:[%s1034_s1 + $0x348] sm:$0xff] }
  0x1c   :  { %184 = vmatpush.msra.mxu1 %v55_v44  ;;  %205 = vmatpush.msra.mxu2 %v70_v46  ;;  %v109_v17 = vld [vmem:[%s1034_s1 + $0x248] sm:$0xff]  ;;  %v126_v18 = vld [vmem:[%s1034_s1 + $0x2d0] sm:$0xff]  ;;  %v140_v20 = vld [vmem:[%s1034_s1 + $0x340] sm:$0xff] }
  0x1d   :  { %165 = vmatpush.msra.mxu0 %v38_v47  ;;  %222 = vmatpush.msra.mxu3 %v89_v63  ;;  %v31_v19 = vld [vmem:[%s1035_s0 + $0x10] sm:$0xff]  ;;  %v108_v21 = vld [vmem:[%s1034_s1 + $0x240] sm:$0xff]  ;;  %v125_v22 = vld [vmem:[%s1034_s1 + $0x2c8] sm:$0xff] }
  0x1e   :  { %185 = vmatpush.msra.mxu1 %v54_v48  ;;  %206 = vmatpush.msra.mxu2 %v69_v50  ;;  %v84_v23 = vld [vmem:[%s1034_s1 + $0x180] sm:$0xff]  ;;  %v139_v24 = vld [vmem:[%s1034_s1 + $0x338] sm:$0xff]  ;;  %v138_v28 = vld [vmem:[%s1034_s1 + $0x330] sm:$0xff] }
  0x1f   :  { %166 = vmatpush.msra.mxu0 %v37_v51  ;;  %223 = vmatpush.msra.mxu3 %v88_v3  ;;  %v107_v25 = vld [vmem:[%s1034_s1 + $0x238] sm:$0xff]  ;;  %v124_v26 = vld [vmem:[%s1034_s1 + $0x2c0] sm:$0xff]  ;;  %v106_v29 = vld [vmem:[%s1034_s1 + $0x230] sm:$0xff] }
  0x20   :  { %186 = vmatpush.msra.mxu1 %v53_v52  ;;  %207 = vmatpush.msra.mxu2 %v68_v54  ;;  %v29_v27 = vld [vmem:[%s1035_s0] sm:$0xff]  ;;  %v123_v30 = vld [vmem:[%s1034_s1 + $0x2b8] sm:$0xff]  ;;  %v137_v32 = vld [vmem:[%s1034_s1 + $0x328] sm:$0xff] }
  0x21   :  { %167 = vmatpush.msra.mxu0 %v36_v55  ;;  %224 = vmatpush.msra.mxu3 %v87_v7  ;;  %v32_v31 = vld [vmem:[%s1035_s0 + $0x18] sm:$0xff]  ;;  %v105_v33 = vld [vmem:[%s1034_s1 + $0x228] sm:$0xff]  ;;  %v122_v34 = vld [vmem:[%s1034_s1 + $0x2b0] sm:$0xff] }
  0x22   :  { %272 = vmatpush.msrb.mxu2 %v147_v56  ;;  %187 = vmatpush.msra.mxu1 %v52_v58  ;;  %v858_v35 = vld [vmem:[%s1037_s7] sm:$0xff]  ;;  %v121_v38 = vld [vmem:[%s1034_s1 + $0x2a8] sm:$0xff]  ;;  %v308_v39 = vld [vmem:[%s1038_s3 + $0x78] sm:$0xff] }
  0x23   :  { %232 = vmatpush.msrb.mxu0 %v115_v57  ;;  %225 = vmatpush.msra.mxu3 %v86_v11  ;;  %v136_v36 = vld [vmem:[%s1034_s1 + $0x320] sm:$0xff]  ;;  %v135_v40 = vld [vmem:[%s1034_s1 + $0x318] sm:$0xff]  ;;  %v307_v43 = vld [vmem:[%s1038_s3 + $0x70] sm:$0xff] }
  0x24   :  { %273 = vmatpush.msrb.mxu2 %v146_v60  ;;  %252 = vmatpush.msrb.mxu1 %v131_v62  ;;  %v104_v37 = vld [vmem:[%s1034_s1 + $0x220] sm:$0xff]  ;;  %v103_v41 = vld [vmem:[%s1034_s1 + $0x218] sm:$0xff]  ;;  %v134_v44 = vld [vmem:[%s1034_s1 + $0x310] sm:$0xff] }
  0x25   :  { %233 = vmatpush.msrb.mxu0 %v114_v61  ;;  %226 = vmatpush.msra.mxu3 %v85_v15  ;;  %v120_v42 = vld [vmem:[%s1034_s1 + $0x2a0] sm:$0xff]  ;;  %v30_v45 = vld [vmem:[%s1035_s0 + $0x8] sm:$0xff]  ;;  %v102_v46 = vld [vmem:[%s1034_s1 + $0x210] sm:$0xff] }
  0x26   :  { %274 = vmatpush.msrb.mxu2 %v145_v0  ;;  %253 = vmatpush.msrb.mxu1 %v130_v2  ;;  %v119_v47 = vld [vmem:[%s1034_s1 + $0x298] sm:$0xff]  ;;  %v133_v48 = vld [vmem:[%s1034_s1 + $0x308] sm:$0xff]  ;;  %v118_v51 = vld [vmem:[%s1034_s1 + $0x290] sm:$0xff] }
  0x27   :  { %234 = vmatpush.msrb.mxu0 %v113_v1  ;;  %208 = vmatmul.f32.vlgmr.msra.gmra.mxu2 %v31_v19  ;;  %v306_v49 = vld [vmem:[%s1038_s3 + $0x68] sm:$0xff]  ;;  %v132_v52 = vld [vmem:[%s1034_s1 + $0x300] sm:$0xff]  ;;  %v35_v54 = vld [vmem:[%s1035_s0 + $0x30] sm:$0xff] }
  0x28   :  { %275 = vmatpush.msrb.mxu2 %v144_v4  ;;  %254 = vmatpush.msrb.mxu1 %v129_v6  ;;  %v101_v50 = vld [vmem:[%s1034_s1 + $0x208] sm:$0xff]  ;;  %v305_v53 = vld [vmem:[%s1038_s3 + $0x60] sm:$0xff]  ;;  %v304_v58 = vld [vmem:[%s1038_s3 + $0x58] sm:$0xff] }
  0x29   :  { %235 = vmatpush.msrb.mxu0 %v112_v5  ;;  %227 = vmatpush.msra.mxu3 %v84_v23  ;;  %v100_v55 = vld [vmem:[%s1034_s1 + $0x200] sm:$0xff]  ;;  %v117_v56 = vld [vmem:[%s1034_s1 + $0x288] sm:$0xff]  ;;  %v303_v61 = vld [vmem:[%s1038_s3 + $0x50] sm:$0xff] }
  0x2a   :  { %276 = vmatpush.msrb.mxu2 %v143_v8  ;;  %255 = vmatpush.msrb.mxu1 %v128_v10  ;;  %v33_v57 = vld [vmem:[%s1035_s0 + $0x20] sm:$0xff]  ;;  %v34_v60 = vld [vmem:[%s1035_s0 + $0x28] sm:$0xff]  ;;  %v300_v0 = vld [vmem:[%s1038_s3 + $0x38] sm:$0xff] }
  0x2b   :  { %236 = vmatpush.msrb.mxu0 %v111_v9  ;;  %228 = vmatmul.f32.vlgmr.msra.gmra.mxu3 %v32_v31  ;;  %v116_v59 = vld [vmem:[%s1034_s1 + $0x280] sm:$0xff]  ;;  %v302_v62 = vld [vmem:[%s1038_s3 + $0x48] sm:$0xff]  ;;  %v299_v1 = vld [vmem:[%s1038_s3 + $0x30] sm:$0xff]  ;;  %s506_s1 = smov 126  }
  0x2c   :  { %277 = vmatpush.msrb.mxu2 %v142_v12  ;;  %256 = vmatpush.msrb.mxu1 %v127_v14  ;;  %v301_v63 = vld [vmem:[%s1038_s3 + $0x40] sm:$0xff]  ;;  %v298_v2 = vld [vmem:[%s1038_s3 + $0x28] sm:$0xff]  ;;  %v296_v4 = vld [vmem:[%s1038_s3 + $0x18] sm:$0xff] }
  0x2d   :  { %237 = vmatpush.msrb.mxu0 %v110_v13  ;;  %401 = vrot.lane.b32.xlu0 %v858_v35, %s505_s18  ;;  %v297_v3 = vld [vmem:[%s1038_s3 + $0x20] sm:$0xff]  ;;  %v295_v5 = vld [vmem:[%s1038_s3 + $0x10] sm:$0xff]  ;;  %v294_v6 = vld [vmem:[%s1038_s3 + $0x8] sm:$0xff] }
  0x2e   :  { %278 = vmatpush.msrb.mxu2 %v141_v16  ;;  %257 = vmatpush.msrb.mxu1 %v126_v18  ;;  %v293_v7 = vld [vmem:[%s1038_s3] sm:$0xff]  ;;  %v349_v9 = vld [vmem:[%s1040_s5 + $0x78] sm:$0xff]  ;;  %v348_v10 = vld [vmem:[%s1040_s5 + $0x70] sm:$0xff] }
  0x2f   :  { %238 = vmatpush.msrb.mxu0 %v109_v17  ;;  %313 = vmatpush.msrb.mxu3 %v308_v39  ;;  %v347_v12 = vld [vmem:[%s1040_s5 + $0x68] sm:$0xff]  ;;  %v346_v14 = vld [vmem:[%s1040_s5 + $0x60] sm:$0xff]  ;;  %v345_v15 = vld [vmem:[%s1040_s5 + $0x58] sm:$0xff] }
  0x30   :  { %279 = vmatpush.msrb.mxu2 %v140_v20  ;;  %258 = vmatpush.msrb.mxu1 %v125_v22  ;;  %v344_v16 = vld [vmem:[%s1040_s5 + $0x50] sm:$0xff]  ;;  %v496_v17 = vld [vmem:[%s1036_s2] ss:$0 sm:$0xff]  ;;  %v343_v19 = vld [vmem:[%s1040_s5 + $0x48] sm:$0xff] }
  0x31   :  { %239 = vmatpush.msrb.mxu0 %v108_v21  ;;  %314 = vmatpush.msrb.mxu3 %v307_v43  ;;  %v342_v20 = vld [vmem:[%s1040_s5 + $0x40] sm:$0xff]  ;;  %v341_v22 = vld [vmem:[%s1040_s5 + $0x38] sm:$0xff] }
  0x32   :  { %280 = vmatpush.msrb.mxu2 %v139_v24  ;;  %259 = vmatpush.msrb.mxu1 %v124_v26  ;;  %v334_v43 = vld [vmem:[%s1040_s5] sm:$0xff] }
  0x33   :  { %240 = vmatpush.msrb.mxu0 %v107_v25  ;;  %188 = vmatmul.f32.vlgmr.msra.gmra.mxu1 %v30_v45  ;;  %v340_v25 = vld [vmem:[%s1040_s5 + $0x30] sm:$0xff]  ;;  %v507_v45 = vmov 2  }
  0x34   :  { %168 = vmatmul.f32.vlgmr.msra.gmra.mxu0 %v29_v27  ;;  %281 = vmatpush.msrb.mxu2 %v138_v28  ;;  %v339_v28 = vld [vmem:[%s1040_s5 + $0x28] sm:$0xff] }
  0x35   :  { %241 = vmatpush.msrb.mxu0 %v106_v29  ;;  %260 = vmatpush.msrb.mxu1 %v123_v30  ;;  %v338_v30 = vld [vmem:[%s1040_s5 + $0x20] sm:$0xff] }
  0x36   :  { %282 = vmatpush.msrb.mxu2 %v137_v32  ;;  %315 = vmatpush.msrb.mxu3 %v306_v49  ;;  %v497_v49 = vld [vmem:[%s1039_s4] ss:$0 sm:$0xff]  ;;  %s511_s4 = smov 120  }
  0x37   :  { %242 = vmatpush.msrb.mxu0 %v105_v33  ;;  %261 = vmatpush.msrb.mxu1 %v122_v34  ;;  %v337_v33 = vld [vmem:[%s1040_s5 + $0x18] sm:$0xff] }
  0x38   :  { %283 = vmatpush.msrb.mxu2 %v136_v36  ;;  %316 = vmatpush.msrb.mxu3 %v305_v53  ;;  %v498_v53 = vld [vmem:[%s1041_s6] ss:$0 sm:$0xff]  ;;  %s512_s6 = smov 8  }
  0x39   :  { %243 = vmatpush.msrb.mxu0 %v104_v37  ;;  %262 = vmatpush.msrb.mxu1 %v121_v38 }
  0x3a   :  { %284 = vmatpush.msrb.mxu2 %v135_v40  ;;  %317 = vmatpush.msrb.mxu3 %v304_v58 }
  0x3b   :  { %244 = vmatpush.msrb.mxu0 %v103_v41  ;;  %263 = vmatpush.msrb.mxu1 %v120_v42  ;;  %v336_v41 = vld [vmem:[%s1040_s5 + $0x10] sm:$0xff]  ;;  %v335_v42 = vld [vmem:[%s1040_s5 + $0x8] sm:$0xff] }
  0x3c   :  { %285 = vmatpush.msrb.mxu2 %v134_v44  ;;  %318 = vmatpush.msrb.mxu3 %v303_v61 }
  0x3d   :  { %245 = vmatpush.msrb.mxu0 %v102_v46  ;;  %264 = vmatpush.msrb.mxu1 %v119_v47  ;;  %v508_v47 = vmov 1  }
  0x3e   :  { %286 = vmatpush.msrb.mxu2 %v133_v48  ;;  %319 = vmatpush.msrb.mxu3 %v302_v62  ;;  %v509_v48 = vmov 3  }
  0x3f   :  { %246 = vmatpush.msrb.mxu0 %v101_v50  ;;  %265 = vmatpush.msrb.mxu1 %v118_v51 }
  0x40   :  { %287 = vmatpush.msrb.mxu2 %v132_v52  ;;  %320 = vmatpush.msrb.mxu3 %v301_v63 }
  0x41   :  { %288 = vmatmul.f32.vlgmr.msrb.gmra.mxu2 %v35_v54  ;;  %247 = vmatpush.msrb.mxu0 %v100_v55 }
  0x42   :  { %266 = vmatpush.msrb.mxu1 %v117_v56  ;;  %248 = vmatmul.f32.vlgmr.msrb.gmra.mxu0 %v33_v57 }
  0x43   :  { %321 = vmatpush.msrb.mxu3 %v300_v0  ;;  %354 = vmatpush.msra.mxu0 %v349_v9 }
  0x44   :  { %267 = vmatpush.msrb.mxu1 %v116_v59  ;;  %492 = vset.pattern.permute.xlu1 %v507_v45 }
  0x45   :  { %268 = vmatmul.f32.vlgmr.msrb.gmra.mxu1 %v34_v60  ;;  %322 = vmatpush.msrb.mxu3 %v299_v1 }
  0x46   :  { %355 = vmatpush.msra.mxu0 %v348_v10  ;;  %495 = vset.pattern.permute.xlu0 %v508_v47 }
  0x47   :  { %323 = vmatpush.msrb.mxu3 %v298_v2 }
  0x48   :  { %356 = vmatpush.msra.mxu0 %v347_v12 }
  0x49   :  { %324 = vmatpush.msrb.mxu3 %v297_v3 }
  0x4a   :  { %357 = vmatpush.msra.mxu0 %v346_v14 }
  0x4b   :  { %325 = vmatpush.msrb.mxu3 %v296_v4 }
  0x4c   :  { %358 = vmatpush.msra.mxu0 %v345_v15 }
  0x4d   :  { %326 = vmatpush.msrb.mxu3 %v295_v5 }
  0x4e   :  { %359 = vmatpush.msra.mxu0 %v344_v16 }
  0x4f   :  { %327 = vmatpush.msrb.mxu3 %v294_v6 }
  0x50   :  { %360 = vmatpush.msra.mxu0 %v343_v19 }
  0x51   :  { %328 = vmatpush.msrb.mxu3 %v293_v7 }
  0x52   :  { %361 = vmatpush.msra.mxu0 %v342_v20 }
  0x54   :  { %362 = vmatpush.msra.mxu0 %v341_v22 }
  0x56   :  { %363 = vmatpush.msra.mxu0 %v340_v25 }
  0x58   :  { %364 = vmatpush.msra.mxu0 %v339_v28 }
  0x5a   :  { %365 = vmatpush.msra.mxu0 %v338_v30 }
  0x5c   :  { %366 = vmatpush.msra.mxu0 %v337_v33 }
  0x5e   :  { %367 = vmatpush.msra.mxu0 %v336_v41 }
  0x60   :  { %368 = vmatpush.msra.mxu0 %v335_v42 }
  0x62   :  { %369 = vmatpush.msra.mxu0 %v334_v43 }
  0x9f   :  { %v402_v8 = vpop.permute.xlu0 %401 }
  0xa0   :  { %v404_v11 = vsub.f32 %v858_v35, %v402_v8 }
  0xa2   :  { %v405_v13 = vmul.f32 0.5, %v404_v11  ;;  %416 = vperm.xlu1 %492, %v404_v11  }
  0xa4   :  { %407 = vrot.lane.b32.xlu0 %v405_v13, %s506_s1 }
  0xaa   :  { %v209_v24 = vpop.f32.mrf.mxu2  ;;  %493 = vset.pattern.permute.xlu1 %v509_v48 }
  0xab   :  { %427 = vperm.xlu1 %493, %v404_v11  }
  0xae   :  { %v229_v27 = vpop.f32.mrf.mxu3 }
  0xb0   :  { %v189_v23 = vpop.f32.mrf.mxu1 }
  0xb1   :  { %v169_v18 = vpop.f32.mrf.mxu0 }
  0xb2   :  { %v170_v21 = vadd.f32 %v496_v17, %v169_v18 }
  0xb4   :  { %v190_v26 = vadd.f32 %v189_v23, %v170_v21 }
  0xb6   :  { %v210_v29 = vadd.f32 %v209_v24, %v190_v26 }
  0xb8   :  { %v230_v31 = vadd.f32 %v229_v27, %v210_v29 }
  0xbf   :  { %v249_v32 = vpop.f32.mrf.mxu0 }
  0xc0   :  { %v250_v34 = vadd.f32 %v249_v32, %v230_v31 }
  0xc2   :  { %v269_v36 = vpop.f32.mrf.mxu1 }
  0xc3   :  { %v270_v37 = vadd.f32 %v269_v36, %v250_v34 }
  0xc4   :  { %v289_v38 = vpop.f32.mrf.mxu2 }
  0xc5   :  { %v290_v39 = vadd.f32 %v289_v38, %v270_v37 }
  0xc7   :  { %v292_v40 = vmax.f32 %v290_v39, 0.0 }
  0xc9   :  { %329 = vmatmul.f32.vlgmr.msrb.gmra.mxu3 %v292_v40 }
 0x114   :  { %v417_v60 = vpop.permute.xlu1 %416 }
 0x116   :  { %v408_v44 = vpop.permute.xlu0 %407 }
 0x117   :  { %v410_v46 = vadd.f32 %v408_v44, %v858_v35  ;;  %v510_v35 = vmov 0  }
 0x118   :  { %494 = vset.pattern.permute.xlu2 %v510_v35 }
 0x119   :  { %432 = vperm.xlu0 %495, %v410_v46  }
 0x11d   :  { %v428_v0 = vpop.permute.xlu1 %427 }
 0x14c   :  { %v330_v50 = vpop.f32.mrf.mxu3 }
 0x14d   :  { %v331_v51 = vadd.f32 %v497_v49, %v330_v50 }
 0x14f   :  { %v333_v52 = vmax.f32 %v331_v51, 0.0 }
 0x151   :  { %370 = vmatmul.f32.vlgmr.msra.gmra.mxu0 %v333_v52 }
 0x18b   :  { %v433_v17 = vpop.permute.xlu0 %432 }
 0x1ce   :  { %v371_v54 = vpop.f32.mrf.mxu0 }
 0x1cf   :  { %v372_v55 = vadd.f32 %v498_v53, %v371_v54 }
 0x1d1   :  { %v412_v56 = vmul.f32 0.2, %v372_v55  ;;  %v375_v57 = vsel %vm374_vm0, %v372_v55, -inf  ;;  %v411_v6 = vmul.f32 0.1, %v372_v55 }
 0x1d2   :  { %376 = vmax.xlane.f32.xlu2 %v375_v57 }
 0x1d3   :  { %v413_v58 = vmin.f32 %v412_v56, 4.1351666  ;;  %v419_v9 = vmul.f32 %v417_v60, %v411_v6  ;;  %v430_v15 = vmul.f32 %v428_v0, %v411_v6 }
 0x1d5   :  { %v436_v59 = vmul.f32 1.442695, %v413_v58  ;;  %v435_v19 = vadd.f32 %v433_v17, %v430_v15 }
 0x1d7   :  { %499 = vpow2.f32 %v436_v59 }
 0x1dd   :  { %v500_v61 = vpop.eup %499 }
 0x1de   :  { %v438_v62 = vmul.f32 %v500_v61, %v417_v60  ;;  %v439_v1 = vmul.f32 %v500_v61, %v428_v0 }
 0x1e0   :  { %v440_v63 = vmul.f32 0.5, %v438_v62  ;;  %v448_v2 = vmul.f32 0.5, %v439_v1 }
 0x1e2   :  { %442 = vrot.lane.b32.xlu1 %v440_v63, %s511_s4 }
 0x1ea   :  { %450 = vrot.lane.b32.xlu1 %v448_v2, %s511_s4  ;;  %422 = vperm.xlu2 %494, %v410_v46  }
 0x245   :  { %v377_v3 = vpop.xlane.xlu2 %376 }
 0x246   :  { %v378_v4 = vsub.f32 %v372_v55, %v377_v3 }
 0x248   :  { %v379_v5 = vmul.f32 1.442695, %v378_v4 }
 0x24a   :  { %501 = vpow2.f32 %v379_v5 }
 0x24d   :  { %v423_v8 = vpop.permute.xlu2 %422 }
 0x24e   :  { %v425_v11 = vadd.f32 %v423_v8, %v419_v9 }
 0x250   :  { %v502_v7 = vpop.eup %501 }
 0x251   :  { %v381_v10 = vsel %vm374_vm0, %v502_v7, 0.0 }
 0x252   :  { %382 = vadd.xlane.f32.xlu0 %v381_v10 }
 0x254   :  { %v443_v12 = vpop.permute.xlu1 %442 }
 0x255   :  { %v445_v13 = vsub.f32 %v425_v11, %v443_v12  ;;  %v456_v14 = vadd.f32 %v443_v12, %v425_v11 }
 0x257   :  { %v457_v16 = vmax.f32 %v456_v14, 0.0  ;;  %v446_v32 = vmax.f32 %v445_v13, 0.0 }
 0x259   :  { %v458_v18 = vmin.f32 %v457_v16, 64.0  ;;  %v447_v39 = vmin.f32 %v446_v32, 64.0 }
 0x25b   :  { %463 = vrot.lane.b32.xlu1 %v458_v18, %s512_s6 }
 0x25c   :  { %v451_v20 = vpop.permute.xlu1 %450 }
 0x25d   :  { %v459_v21 = vadd.f32 %v451_v20, %v435_v19  ;;  %v453_v28 = vsub.f32 %v435_v19, %v451_v20 }
 0x25f   :  { %v460_v22 = vmax.f32 %v459_v21, 0.0  ;;  %v454_v34 = vmax.f32 %v453_v28, 0.0 }
 0x261   :  { %v461_v23 = vmin.f32 %v460_v22, 64.0  ;;  %v455_v41 = vmin.f32 %v454_v34, 64.0 }
 0x263   :  { %467 = vrot.lane.b32.xlu2 %v461_v23, %s512_s6 }
 0x2bd   :  { %v468_v45 = vpop.permute.xlu2 %467 }
 0x2c5   :  { %v383_v24 = vpop.xlane.xlu0 %382 }
 0x2c6   :  { %503 = vrcp.f32 %v383_v24  ;;  %v395_v29 = vand.u32 2147483648, %v383_v24  ;;  %v393_v31 = vand.u32 2147483647, %v383_v24  ;;  %vm389_vm2 = vweird.f32 %v383_v24 }
 0x2c8   :  { %v396_v36 = vor.u32 1.1754944e-38, %v395_v29  ;;  %vm394_vm4 = vcmp.eq.f32.partialorder %v393_v31, 8.507059e+37 }
 0x2cc   :  { %v504_v25 = vpop.eup %503 }
 0x2cd   :  { %v385_v26 = vmul.f32 %v504_v25, %v383_v24  ;;  %vm390_vm1 = vweird.f32 %v504_v25  ;;  %v464_v43 = vpop.permute.xlu1 %463 }
 0x2ce   :  { %vm391_vm3 = vmor %vm389_vm2, %vm390_vm1 }
 0x2cf   :  { %v386_v27 = vsub.f32 1.0, %v385_v26 }
 0x2d1   :  { %v387_v30 = vmul.f32 %v504_v25, %v386_v27 }
 0x2d3   :  { %v388_v33 = vadd.f32 %v504_v25, %v387_v30 }
 0x2d5   :  { %v392_v37 = vsel %vm391_vm3, %v504_v25, %v388_v33 }
 0x2d6   :  { %v397_v38 = vsel %vm394_vm4, %v396_v36, %v392_v37 }
 0x2d7   :  { %v398_v40 = vmul.f32 %v502_v7, %v397_v38 }
 0x2d9   :  { %v470_v42 = vsel %vm374_vm0, %v398_v40, %v447_v39 }
 0x2da   :  { %v472_v44 = vsel %vm471_vm5, %v470_v42, %v455_v41 }
 0x2db   :  { %v474_v46 = vsel %vm473_vm6, %v472_v44, %v464_v43 }
 0x2dc   :  { %v476_v47 = vsel %vm475_vm7, %v474_v46, %v468_v45 }
 0x2dd   :  { %v478_v48 = vsel %vm477_vm8, %v476_v47, 0.0 }
 0x2de   :  { %479 = vst [vmem:[%s1042_s8] sm:$0xff] %v478_v48 }

</bundles_post_ra>
